<compile_context>
chip_gen: v6e
topology: v6e:2x2x1
jax: 0.10.0
libtpu: 0.0.40
codegen_flags: <defaults>
</compile_context>

<pallas_src>
import jax
import jax.numpy as jnp
from jax.experimental import pallas as pl
from jax.experimental.pallas import tpu as pltpu

_LANE_CANDIDATES = (1024, 512, 256, 128)
_VMEM_WORKING_SET_BYTES = 16 << 20   # per-grid-step working-set budget (all gens)
_VMEM_LIMIT_BYTES = 32 << 20         # scoped VMEM limit (<= 64 MiB v7x physical)
_MIN_GRID_STEPS = 8                  # feed both v7x cores / hide per-step overhead


def _sublane_multiple(dtype) -> int:
    return {4: 8, 2: 16, 1: 32}.get(jnp.dtype(dtype).itemsize, 8)


def _choose_view(shape):
    """Copy-free 2-D (rows, lane) view of a contiguous [C, H, W] image."""
    c, h, w = shape
    total = c * h * w
    for lane in _LANE_CANDIDATES:
        if total % lane == 0:
            return total // lane, lane
    # Fallback: natural [C*H, W] view.  Last dim equals the full array extent so
    # the BlockSpec is always legal; stores are masked if W is not a multiple of
    # 128, but no wrapper-side pad / slice copy is ever needed.
    return c * h, w


def _plan_tile_rows(rows, lane, n, dtype):
    """Row-tile size from the TOTAL per-step working set:
       2*(n+1) double-buffered native slabs + ~2 f32-sized temporaries."""
    itemsize = jnp.dtype(dtype).itemsize
    sub = _sublane_multiple(dtype)
    bytes_per_row = lane * (2 * (n + 1) * itemsize + 2 * 4)
    max_rows = max(sub, (_VMEM_WORKING_SET_BYTES // bytes_per_row) // sub * sub)
    # Aim for >= _MIN_GRID_STEPS grid steps when the data allows it.
    target = max(sub, pl.cdiv(pl.cdiv(rows, _MIN_GRID_STEPS), sub) * sub)
    tile_rows = min(max_rows, target)
    if tile_rows >= rows:
        tile_rows = rows            # single full-extent block (always legal)
    return tile_rows


def _make_mixup_kernel(n):
    """Weighted blend of N image row-tiles.

    Kernel args: w_ref (SMEM (N,) f32), N image tiles (VMEM, native dtype),
    out tile (VMEM, native dtype)."""
    def kernel(w_ref, *refs):
        image_refs = refs[:n]
        out_ref = refs[n]
        acc = image_refs[0][...].astype(jnp.float32) * w_ref[0]
        for i in range(1, n):
            acc = acc + image_refs[i][...].astype(jnp.float32) * w_ref[i]
        if jnp.issubdtype(out_ref.dtype, jnp.integer):
            info = jnp.iinfo(out_ref.dtype)
            # Convex combination stays in range; clip guards float overshoot.
            # The astype below truncates, matching torch's float->int cast.
            acc = jnp.clip(acc, float(info.min), float(info.max))
        out_ref[...] = acc.astype(out_ref.dtype)
    return kernel


def mixup_blend(image_list, weights):
    """image_list: list of N [C, H, W] arrays (same shape & dtype),
    weights: [N] float32 (already normalized) -> blended [C, H, W] image."""
    n = len(image_list)
    shape = tuple(image_list[0].shape)
    dtype = image_list[0].dtype
    itemsize = jnp.dtype(dtype).itemsize
    total = shape[0] * shape[1] * shape[2]

    rows, lane = _choose_view(shape)
    tile_rows = _plan_tile_rows(rows, lane, n, dtype)
    grid = (pl.cdiv(rows, tile_rows),)

    # Copy-free bitcast reshapes (no stack, no pad).
    views = [img.reshape(rows, lane) for img in image_list]

    def idx_map(ri, w_ref):
        return (ri, 0)

    grid_spec = pltpu.PrefetchScalarGridSpec(
        num_scalar_prefetch=1,                      # weights -> SMEM
        grid=grid,
        in_specs=[pl.BlockSpec((tile_rows, lane), idx_map) for _ in range(n)],
        out_specs=pl.BlockSpec((tile_rows, lane), idx_map),
    )
    cost = pl.CostEstimate(
        flops=(2 * n - 1) * total,
        transcendentals=0,
        bytes_accessed=(n + 1) * total * itemsize + n * 4,
    )
    out2d = pl.pallas_call(
        _make_mixup_kernel(n),
        out_shape=jax.ShapeDtypeStruct((rows, lane), dtype),
        grid_spec=grid_spec,
        compiler_params=pltpu.CompilerParams(
            dimension_semantics=("parallel",),
            vmem_limit_bytes=_VMEM_LIMIT_BYTES,
        ),
        cost_estimate=cost,
    )(weights, *views)

    return out2d.reshape(shape)


def cached_mixup_mix_transform(image_list, box_list, label_list, key):
    """JAX equivalent of MixUp.mix_transform (used by CachedMixUp.forward).

    image_list : list of [C, H, W] arrays (same shape; image_list_from_tensors
                 padding is a no-op for equally-sized images)
    box_list   : list of [Ki, 4] arrays
    label_list : list of [Ki] arrays
    """
    n = len(image_list)
    ratios = jax.random.beta(key, 32.0, 32.0, shape=(n,)).astype(jnp.float32)
    weights = ratios / jnp.sum(ratios)                  # normalize once, N scalars
    image_final = mixup_blend(image_list, weights)      # native dtype out
    box_final = jnp.concatenate(box_list, axis=0)
    label_final = jnp.concatenate(label_list, axis=0)
    return image_final, box_final, label_final


# TODO(synk): cache bookkeeping (results_cache append/pop), the random p-gate,
# dataset reload in MixUp.forward, and datapoints.Image/BoundingBox wrapping are
# Python-side control flow with no tensor compute; intentionally left outside.
# TODO(synk): if many mixup instances are produced per step, batch them into one
# pallas_call with a leading parallel grid axis to amortize launch overhead.


if __name__ == "__main__":
    key = jax.random.PRNGKey(0)
    (k_img1, k_img2, k_box1, k_box2, k_ratio,
     k_big1, k_big2, k_u8a, k_u8b) = jax.random.split(key, 9)

    # --- test 1: typical 2-image mixup, f32, lane-dense divisor path ---
    C, H, W = 4, 16, 16
    img = jax.random.uniform(k_img1, (C, H, W), dtype=jnp.float32)        # current sample
    extra_img = jax.random.uniform(k_img2, (C, H, W), dtype=jnp.float32)  # cached sample

    boxes = jax.random.uniform(k_box1, (3, 4), dtype=jnp.float32) * 16.0
    extra_boxes = jax.random.uniform(k_box2, (2, 4), dtype=jnp.float32) * 16.0
    labels = jnp.array([1, 2, 3], dtype=jnp.int32)
    extra_labels = jnp.array([4, 5], dtype=jnp.int32)

    image_final, box_final, label_final = cached_mixup_mix_transform(
        [img, extra_img], [boxes, extra_boxes], [labels, extra_labels], k_ratio
    )
    jax.block_until_ready((image_final, box_final, label_final))

    ratios = jax.random.beta(k_ratio, 32.0, 32.0, shape=(2,)).astype(jnp.float32)
    ratios = ratios / jnp.sum(ratios)
    ref = img * ratios[0] + extra_img * ratios[1]
    assert image_final.shape == (C, H, W) and image_final.dtype == jnp.float32
    assert box_final.shape == (5, 4)
    assert label_final.shape == (5,)
    assert jnp.allclose(image_final, ref, atol=1e-5, rtol=1e-5)

    # --- test 2: non-128-divisible size -> [C*H, W] fallback view, multi-step grid,
    #             masked partial last block (no pad / slice copies anywhere) ---
    C2, H2, W2 = 3, 100, 100
    big1 = jax.random.uniform(k_big1, (C2, H2, W2), dtype=jnp.float32)
    big2 = jax.random.uniform(k_big2, (C2, H2, W2), dtype=jnp.float32)
    img2_final, _, _ = cached_mixup_mix_transform(
        [big1, big2], [boxes, extra_boxes], [labels, extra_labels], k_ratio
    )
    jax.block_until_ready(img2_final)
    ref2 = big1 * ratios[0] + big2 * ratios[1]
    assert img2_final.shape == (C2, H2, W2)
    assert jnp.allclose(img2_final, ref2, atol=1e-5, rtol=1e-5)

    # --- test 3: integer (uint8) image dtype -> in-kernel f32 MAC, clip, truncating cast ---
    C3, H3, W3 = 3, 16, 16
    u1 = jax.random.randint(k_u8a, (C3, H3, W3), 0, 256, dtype=jnp.int32).astype(jnp.uint8)
    u2 = jax.random.randint(k_u8b, (C3, H3, W3), 0, 256, dtype=jnp.int32).astype(jnp.uint8)
    img3_final, _, _ = cached_mixup_mix_transform(
        [u1, u2], [boxes, extra_boxes], [labels, extra_labels], k_ratio
    )
    jax.block_until_ready(img3_final)
    ref3_f = u1.astype(jnp.float32) * ratios[0] + u2.astype(jnp.float32) * ratios[1]
    ref3 = jnp.clip(ref3_f, 0.0, 255.0).astype(jnp.uint8)
    assert img3_final.shape == (C3, H3, W3) and img3_final.dtype == jnp.uint8
    diff = jnp.abs(img3_final.astype(jnp.int32) - ref3.astype(jnp.int32))
    assert int(jnp.max(diff)) <= 1   # truncation boundary tolerance

    print("KERNEL_OK")
</pallas_src>

<mosaic_0001>
module attributes {stable_mosaic.version = 11 : i64} {
  func.func @kernel(%arg0: i32, %arg1: memref<2xf32, #tpu.memory_space<smem>>, %arg2: memref<1x1024xf32, #tpu.memory_space<vmem>>, %arg3: memref<1x1024xf32, #tpu.memory_space<vmem>>, %arg4: memref<1x1024xf32, #tpu.memory_space<vmem>>) attributes {dimension_semantics = [#tpu.dimension_semantics<parallel>], iteration_bounds = array<i64: 1>, scalar_prefetch = 1 : i64, scratch_operands = 0 : i64, tpu.core_type = #tpu.core_type<tc>, window_params = [{transform_indices = @transform_0, window_bounds = array<i64: 1, 1024>}, {transform_indices = @transform_1, window_bounds = array<i64: 1, 1024>}, {transform_indices = @transform_2, window_bounds = array<i64: 1, 1024>}]} {
    %c0 = arith.constant 0 : index
    %c0_0 = arith.constant 0 : index
    %0 = vector.load %arg2[%c0, %c0_0] : memref<1x1024xf32, #tpu.memory_space<vmem>>, vector<1x1024xf32>
    %c0_1 = arith.constant 0 : index
    %1 = memref.load %arg1[%c0_1] : memref<2xf32, #tpu.memory_space<smem>>
    %2 = vector.broadcast %1 : f32 to vector<1x1024xf32>
    %3 = arith.mulf %0, %2 : vector<1x1024xf32>
    %c0_2 = arith.constant 0 : index
    %c0_3 = arith.constant 0 : index
    %4 = vector.load %arg3[%c0_2, %c0_3] : memref<1x1024xf32, #tpu.memory_space<vmem>>, vector<1x1024xf32>
    %c1 = arith.constant 1 : index
    %5 = memref.load %arg1[%c1] : memref<2xf32, #tpu.memory_space<smem>>
    %6 = vector.broadcast %5 : f32 to vector<1x1024xf32>
    %7 = arith.mulf %4, %6 : vector<1x1024xf32>
    %8 = arith.addf %3, %7 : vector<1x1024xf32>
    %c0_4 = arith.constant 0 : index
    %c0_5 = arith.constant 0 : index
    %9 = vector.load %arg4[%c0_4, %c0_5] : memref<1x1024xf32, #tpu.memory_space<vmem>>, vector<1x1024xf32>
    tpu.vector_store %arg4[%c0_4, %c0_5], %8 {strides = array<i32>} : memref<1x1024xf32, #tpu.memory_space<vmem>>, vector<1x1024xf32>,
    return
  }
  func.func @transform_0(%arg0: i32, %arg1: memref<2xf32, #tpu.memory_space<smem>>) -> (i32, i32) {
    %c0_i32 = arith.constant 0 : i32
    %c0_i32_0 = arith.constant 0 : i32
    return %arg0, %c0_i32 : i32, i32
  }
  func.func @transform_1(%arg0: i32, %arg1: memref<2xf32, #tpu.memory_space<smem>>) -> (i32, i32) {
    %c0_i32 = arith.constant 0 : i32
    %c0_i32_0 = arith.constant 0 : i32
    return %arg0, %c0_i32 : i32, i32
  }
  func.func @transform_2(%arg0: i32, %arg1: memref<2xf32, #tpu.memory_space<smem>>) -> (i32, i32) {
    %c0_i32 = arith.constant 0 : i32
    %c0_i32_0 = arith.constant 0 : i32
    return %arg0, %c0_i32 : i32, i32
  }
}

</mosaic_0001>

<bundles_post_ra>
// kernel: tpu_custom_call.1
= control target key start
LH: loop header
LB: loop body
LE: loop exit
PB: predicated region body
PF: predicated region fallthrough
CT: control target
= control target key end

     0   :  { %s148_s12 = smov [#allocation3]   ;;  %s184_s0 = inlined_call_operand.hbm [shape: f32[2], index: 0, kind: input, shape index: {}]   ;;  %s185_s1 = inlined_call_operand.hbm [shape: f32[1,1024], index: 1, kind: input, shape index: {}]   ;;  %s186_s2 = inlined_call_operand.hbm [shape: f32[1,1024], index: 2, kind: input, shape index: {}]   ;;  %s187_s3 = inlined_call_operand.hbm [shape: f32[1,1024], index: 3, kind: output, shape index: {}]  }
   0x1   :  { %9 = dma.hbm_to_smem %s184_s0, 16, %s148_s12, [#allocation2] }
   0x2   :  { %140 = dma.done.wait [#allocation2], 16 }
   0x3   :  { %141 = vsyncadd [#allocation2], 4294967280 }
   0x4   :  { %11 = sfence }
   0x5   :  { %12 = vsyncpa [#allocation5], 0 }
   0x6   :  { %13 = vsyncpa [#allocation8], 0 }
   0x7   :  { %14 = vsyncpa [#allocation6], 0  ;;  %s149_s15 = smov [#allocation4]   ;;  %s150_s17 = smov [#allocation7]  }
   0x8   :  { %s21_s16 = sshll.u32 %s149_s15, 4  ;;  %s31_s18 = sshll.u32 %s150_s17, 4  ;;  %s22_s16 = int_to_ptr.vmem [resolvable:$true] %s21_s16  ;;  %s32_s18 = int_to_ptr.vmem [resolvable:$true] %s31_s18 }
   0x9   :  { %s88_s19 = scalar_lea.vmem %s22_s16, 128  ;;  %p93_p1 = scmp.lt.s32.totalorder %s22_s16, %s22_s16 }
   0xa   :  { %p89_p0 = scmp.ne.s32.totalorder %s22_s16, %s88_s19  ;;  %p94_p2 = scmp.lt.s32.totalorder %s88_s19, %s88_s19 }
   0xc   :  { %p95_p3 = por %p94_p2, %p93_p1 }
   0xe   :  { %p96_p4 = pnand %p95_p3, %p89_p0 }
  0x10   :  { %99 = shalt.err (!%p96_p4)
}
  0x11   :  { %24 = dma.hbm_to_vmem [thread:$0]  %s185_s1, 128, %s22_s16, [#allocation5]  }
  0x12   :  { %s108_s21 = scalar_lea.vmem %s32_s18, 128  ;;  %p113_p6 = scmp.lt.s32.totalorder %s32_s18, %s32_s18 }
  0x13   :  { %p109_p5 = scmp.ne.s32.totalorder %s32_s18, %s108_s21  ;;  %p114_p7 = scmp.lt.s32.totalorder %s108_s21, %s108_s21 }
  0x15   :  { %p115_p8 = por %p114_p7, %p113_p6 }
  0x17   :  { %p116_p9 = pnand %p115_p8, %p109_p5 }
  0x19   :  { %119 = shalt.err (!%p116_p9)
}
  0x1a   :  { %34 = dma.hbm_to_vmem [thread:$0]  %s186_s2, 128, %s32_s18, [#allocation8]  }
  0x1b   :  { %142 = dma.done.wait [#allocation5], 128  }
  0x1c   :  { %143 = vsyncadd [#allocation5], 4294967168 }
  0x1d   :  { %144 = dma.done.wait [#allocation8], 128  }
  0x1e   :  { %145 = vsyncadd [#allocation8], 4294967168  ;;  %s42_s24 = sld [smem:[#allocation3]]  ;;  %v41_v0 = vld [vmem:[#allocation4] sm:$0xff]  ;;  %v45_v2 = vld [vmem:[#allocation7] sm:$0xff]  ;;  %s151_s1 = smov [#allocation9]  }
  0x1f   :  { %s67_s25 = sld [smem:[#allocation3 + $0x1]]  ;;  %s57_s26 = sshll.u32 %s151_s1, 4  ;;  %s58_s26 = int_to_ptr.vmem [resolvable:$true] %s57_s26 }
  0x20   :  { %s120_s27 = scalar_lea.vmem %s58_s26, 128  ;;  %p125_p11 = scmp.lt.s32.totalorder %s58_s26, %s58_s26 }
  0x21   :  { %p121_p10 = scmp.ne.s32.totalorder %s58_s26, %s120_s27  ;;  %p126_p12 = scmp.lt.s32.totalorder %s120_s27, %s120_s27 }
  0x23   :  { %p127_p13 = por %p126_p12, %p125_p11 }
  0x24   :  { %v43_v1 = vstv %s42_s24 }
  0x25   :  { %v44_v3 = vmul.f32 %v43_v1, %v41_v0  ;;  %v47_v4 = vstv %s67_s25  ;;  %p128_p0 = pnand %p127_p13, %p121_p10 }
  0x26   :  { %v48_v5 = vmul.f32 %v47_v4, %v45_v2 }
  0x28   :  { %v49_v6 = vadd.f32 %v48_v5, %v44_v3 }
  0x2a   :  { %50 = vst [vmem:[#allocation9] sm:$0xff] %v49_v6 }
  0x2b   :  { %131 = shalt.err (!%p128_p0)
}
  0x2c   :  { %60 = dma.vmem_to_hbm [thread:$0]  %s58_s26, 128, %s187_s3, [#allocation6]  }
  0x2d   :  { %146 = dma.done.wait [#allocation6], 128  }
  0x2e   :  { %147 = vsyncadd [#allocation6], 4294967168 }
  0x2f   :  { %64 = vsyncpa [#allocation5], 1 }
  0x30   :  { %65 = vsyncpa [#allocation8], 1 }
  0x31   :  { %66 = vsyncpa [#allocation6], 1 }

</bundles_post_ra>
